<compile_context>
chip_gen: v7x
topology: tpu7x:2x2x1
jax: 0.10.0
libtpu: 0.0.40
codegen_flags: <defaults>
</compile_context>

<pallas_src>
import functools
import math

import jax
import jax.numpy as jnp
from jax.experimental import pallas as pl
from jax.experimental.pallas import tpu as pltpu


def _round_up(x, m):
    return ((x + m - 1) // m) * m


def _mlp_kernel(n_ref, w1_ref, b1_ref, w2_ref, b2_ref,
                w3_ref, b3_ref, w4_ref, b4_ref, o_ref):
    """Whole 4-layer MLP on a (TM, 1) batch of raw numbers; everything VMEM-resident."""
    # number = value / 100, rounded to bf16 (matches torch.tensor([number], bf16)).
    x = (n_ref[...] / 100.0).astype(jnp.bfloat16)                       # (TM, 1)

    # Layer 1: input_dim == 1  ->  pure VPU broadcast FMA, skip the MXU entirely.
    h = x.astype(jnp.float32) * w1_ref[...].astype(jnp.float32)          # (TM, Hp)
    h = h + b1_ref[...].astype(jnp.float32)
    h = jnp.maximum(h, 0.0).astype(jnp.bfloat16)

    def layer(h_bf16, w_ref, b_ref, relu):
        # bf16 operands, fp32 accumulation (matches PyTorch bf16 linear), ReLU fused
        # on the fp32 accumulator, single bf16 round per layer.
        acc = jnp.dot(h_bf16, w_ref[...], preferred_element_type=jnp.float32)
        acc = acc + b_ref[...].astype(jnp.float32)
        if relu:
            acc = jnp.maximum(acc, 0.0)
        return acc.astype(jnp.bfloat16)

    h = layer(h, w2_ref, b2_ref, True)
    h = layer(h, w3_ref, b3_ref, True)
    o_ref[...] = layer(h, w4_ref, b4_ref, False)


@functools.partial(jax.jit, static_argnames=("output_dim", "block_b"))
def number_encoder_pallas(numbers, params, *, output_dim, block_b=256):
    """numbers: (B,) raw number values (pre-division). Returns (B, output_dim) bf16."""
    nums = jnp.asarray(numbers, jnp.float32).reshape(-1, 1)
    B = nums.shape[0]
    tm = block_b if B >= block_b else _round_up(B, 16)   # 16-row bf16 sublane packing
    b_pad = _round_up(B, tm)
    if b_pad != B:
        nums = jnp.pad(nums, ((0, b_pad - B), (0, 0)))

    (w1, b1), (w2, b2), (w3, b3), (w4, b4) = params
    o_pad = w4.shape[1]                                   # lane-padded output width

    def weight_spec(a):
        return pl.BlockSpec(a.shape, lambda i: (0, 0))    # resident across grid steps

    out = pl.pallas_call(
        _mlp_kernel,
        out_shape=jax.ShapeDtypeStruct((b_pad, o_pad), jnp.bfloat16),
        grid=(b_pad // tm,),
        in_specs=[pl.BlockSpec((tm, 1), lambda i: (i, 0)),
                  weight_spec(w1), weight_spec(b1),
                  weight_spec(w2), weight_spec(b2),
                  weight_spec(w3), weight_spec(b3),
                  weight_spec(w4), weight_spec(b4)],
        out_specs=pl.BlockSpec((tm, o_pad), lambda i: (i, 0)),
        compiler_params=pltpu.CompilerParams(
            dimension_semantics=("parallel",)),            # dual-TC split on v7x
    )(nums, w1, b1, w2, b2, w3, b3, w4, b4)
    return out[:B, :output_dim]


def number_encoder_forward(number_value, params, output_dim):
    """Matches NumberEncoder.forward: one number -> (output_dim,) bf16 vector."""
    nums = jnp.asarray(number_value, jnp.float32).reshape(1)
    return number_encoder_pallas(nums, params, output_dim=output_dim)[0]


def init_params(key, input_dim, hidden_dim, output_dim, lane_pad=128):
    """kaiming_uniform_(nonlinearity='relu') weights, zero biases (as in the module),
    stored transposed (in, out) and zero-padded to 128-lane feature dims."""
    assert input_dim == 1, "forward builds torch.tensor([number]) -> input_dim must be 1"
    hp = _round_up(hidden_dim, lane_pad)
    op = _round_up(output_dim, lane_pad)
    dims = [(input_dim, hidden_dim, input_dim, hp),
            (hidden_dim, hidden_dim, hp, hp),
            (hidden_dim, hidden_dim, hp, hp),
            (hidden_dim, output_dim, hp, op)]
    params = []
    for fan_in, fan_out, pad_in, pad_out in dims:
        key, sub = jax.random.split(key)
        bound = math.sqrt(6.0 / fan_in)   # kaiming uniform, gain=sqrt(2)
        w = jax.random.uniform(sub, (fan_in, fan_out), jnp.float32,
                               minval=-bound, maxval=bound).astype(jnp.bfloat16)
        w = jnp.zeros((pad_in, pad_out), jnp.bfloat16).at[:fan_in, :fan_out].set(w)
        b = jnp.zeros((1, pad_out), jnp.bfloat16)   # module explicitly zero-inits biases
        params.append((w, b))
    return params


def reference_forward(numbers, params, output_dim):
    """Pure-JAX reference with the same per-layer bf16 rounding."""
    x = (jnp.asarray(numbers, jnp.float32).reshape(-1, 1) / 100.0).astype(jnp.bfloat16)
    h = x.astype(jnp.float32)
    n = len(params)
    for i, (w, b) in enumerate(params):
        acc = h @ w.astype(jnp.float32) + b.astype(jnp.float32)
        if i < n - 1:
            acc = jnp.maximum(acc, 0.0)
        h = acc.astype(jnp.bfloat16).astype(jnp.float32)
    return h.astype(jnp.bfloat16)[:, :output_dim]


if __name__ == "__main__":
    INPUT_DIM, HIDDEN_DIM, OUTPUT_DIM = 1, 32, 32
    BATCH = 256

    key = jax.random.PRNGKey(0)
    pkey, nkey = jax.random.split(key)
    params = init_params(pkey, INPUT_DIM, HIDDEN_DIM, OUTPUT_DIM)

    numbers = jax.random.uniform(nkey, (BATCH,), jnp.float32,
                                 minval=-500.0, maxval=500.0)

    # Batched path (primary): one pallas_call for all numbers.
    out = jax.block_until_ready(
        number_encoder_pallas(numbers, params, output_dim=OUTPUT_DIM))
    assert out.shape == (BATCH, OUTPUT_DIM)
    assert out.dtype == jnp.bfloat16
    assert bool(jnp.all(jnp.isfinite(out.astype(jnp.float32))))

    ref = reference_forward(numbers, params, OUTPUT_DIM)
    assert jnp.allclose(out.astype(jnp.float32), ref.astype(jnp.float32),
                        rtol=2e-2, atol=1e-2)

    # Original module API: a single number -> (output_dim,) vector.
    single = jax.block_until_ready(
        number_encoder_forward(42.0, params, OUTPUT_DIM))
    assert single.shape == (OUTPUT_DIM,)
    assert single.dtype == jnp.bfloat16
    assert bool(jnp.all(jnp.isfinite(single.astype(jnp.float32))))

    print("KERNEL_OK")
</pallas_src>

<mosaic_0001>
module attributes {stable_mosaic.version = 11 : i64} {
  func.func @_mlp_kernel(%arg0: i32, %arg1: memref<256x1xf32, #tpu.memory_space<vmem>>, %arg2: memref<1x128xbf16, #tpu.memory_space<vmem>>, %arg3: memref<1x128xbf16, #tpu.memory_space<vmem>>, %arg4: memref<128x128xbf16, #tpu.memory_space<vmem>>, %arg5: memref<1x128xbf16, #tpu.memory_space<vmem>>, %arg6: memref<128x128xbf16, #tpu.memory_space<vmem>>, %arg7: memref<1x128xbf16, #tpu.memory_space<vmem>>, %arg8: memref<128x128xbf16, #tpu.memory_space<vmem>>, %arg9: memref<1x128xbf16, #tpu.memory_space<vmem>>, %arg10: memref<256x128xbf16, #tpu.memory_space<vmem>>) attributes {dimension_semantics = [#tpu.dimension_semantics<parallel>], iteration_bounds = array<i64: 1>, scalar_prefetch = 0 : i64, scratch_operands = 0 : i64, tpu.core_type = #tpu.core_type<tc>, window_params = [{transform_indices = @transform_0, window_bounds = array<i64: 256, 1>}, {pipeline_mode = #tpu.pipeline_mode<synchronous>, transform_indices = @transform_1, window_bounds = array<i64: 1, 128>}, {pipeline_mode = #tpu.pipeline_mode<synchronous>, transform_indices = @transform_2, window_bounds = array<i64: 1, 128>}, {pipeline_mode = #tpu.pipeline_mode<synchronous>, transform_indices = @transform_3, window_bounds = array<i64: 128, 128>}, {pipeline_mode = #tpu.pipeline_mode<synchronous>, transform_indices = @transform_4, window_bounds = array<i64: 1, 128>}, {pipeline_mode = #tpu.pipeline_mode<synchronous>, transform_indices = @transform_5, window_bounds = array<i64: 128, 128>}, {pipeline_mode = #tpu.pipeline_mode<synchronous>, transform_indices = @transform_6, window_bounds = array<i64: 1, 128>}, {pipeline_mode = #tpu.pipeline_mode<synchronous>, transform_indices = @transform_7, window_bounds = array<i64: 128, 128>}, {pipeline_mode = #tpu.pipeline_mode<synchronous>, transform_indices = @transform_8, window_bounds = array<i64: 1, 128>}, {transform_indices = @transform_9, window_bounds = array<i64: 256, 128>}]} {
    %c0 = arith.constant 0 : index
    %c0_0 = arith.constant 0 : index
    %0 = vector.load %arg1[%c0, %c0_0] : memref<256x1xf32, #tpu.memory_space<vmem>>, vector<256x1xf32>
    %cst = arith.constant 1.000000e+02 : f32
    %1 = vector.broadcast %cst : f32 to vector<256x1xf32>
    %2 = arith.divf %0, %1 : vector<256x1xf32>
    %3 = arith.truncf %2 : vector<256x1xf32> to vector<256x1xbf16>
    %4 = arith.extf %3 : vector<256x1xbf16> to vector<256x1xf32>
    %c0_1 = arith.constant 0 : index
    %c0_2 = arith.constant 0 : index
    %5 = vector.load %arg2[%c0_1, %c0_2] : memref<1x128xbf16, #tpu.memory_space<vmem>>, vector<1x128xbf16>
    %6 = arith.extf %5 : vector<1x128xbf16> to vector<1x128xf32>
    %7 = vector.broadcast %4 : vector<256x1xf32> to vector<256x128xf32>
    %8 = vector.broadcast %6 : vector<1x128xf32> to vector<256x128xf32>
    %9 = arith.mulf %7, %8 : vector<256x128xf32>
    %c0_3 = arith.constant 0 : index
    %c0_4 = arith.constant 0 : index
    %10 = vector.load %arg3[%c0_3, %c0_4] : memref<1x128xbf16, #tpu.memory_space<vmem>>, vector<1x128xbf16>
    %11 = arith.extf %10 : vector<1x128xbf16> to vector<1x128xf32>
    %12 = vector.broadcast %11 : vector<1x128xf32> to vector<256x128xf32>
    %13 = arith.addf %9, %12 : vector<256x128xf32>
    %cst_5 = arith.constant 0.000000e+00 : f32
    %14 = vector.broadcast %cst_5 : f32 to vector<256x128xf32>
    %15 = arith.maximumf %13, %14 : vector<256x128xf32>
    %16 = arith.truncf %15 : vector<256x128xf32> to vector<256x128xbf16>
    %c0_6 = arith.constant 0 : index
    %c0_7 = arith.constant 0 : index
    %17 = vector.load %arg4[%c0_6, %c0_7] : memref<128x128xbf16, #tpu.memory_space<vmem>>, vector<128x128xbf16>
    %cst_8 = arith.constant dense<0.000000e+00> : vector<256x128xf32>
    %18 = tpu.matmul %16, %17, %cst_8 {dimension_numbers = #tpu.dot_dimension_numbers<[1], [0], [0], [1], [0, 0, 1, 1], [], []>} : vector<256x128xbf16>, vector<128x128xbf16>, vector<256x128xf32> -> vector<256x128xf32>
    %c0_9 = arith.constant 0 : index
    %c0_10 = arith.constant 0 : index
    %19 = vector.load %arg5[%c0_9, %c0_10] : memref<1x128xbf16, #tpu.memory_space<vmem>>, vector<1x128xbf16>
    %20 = arith.extf %19 : vector<1x128xbf16> to vector<1x128xf32>
    %21 = vector.broadcast %20 : vector<1x128xf32> to vector<256x128xf32>
    %22 = arith.addf %18, %21 : vector<256x128xf32>
    %cst_11 = arith.constant 0.000000e+00 : f32
    %23 = vector.broadcast %cst_11 : f32 to vector<256x128xf32>
    %24 = arith.maximumf %22, %23 : vector<256x128xf32>
    %25 = arith.truncf %24 : vector<256x128xf32> to vector<256x128xbf16>
    %c0_12 = arith.constant 0 : index
    %c0_13 = arith.constant 0 : index
    %26 = vector.load %arg6[%c0_12, %c0_13] : memref<128x128xbf16, #tpu.memory_space<vmem>>, vector<128x128xbf16>
    %cst_14 = arith.constant dense<0.000000e+00> : vector<256x128xf32>
    %27 = tpu.matmul %25, %26, %cst_14 {dimension_numbers = #tpu.dot_dimension_numbers<[1], [0], [0], [1], [0, 0, 1, 1], [], []>} : vector<256x128xbf16>, vector<128x128xbf16>, vector<256x128xf32> -> vector<256x128xf32>
    %c0_15 = arith.constant 0 : index
    %c0_16 = arith.constant 0 : index
    %28 = vector.load %arg7[%c0_15, %c0_16] : memref<1x128xbf16, #tpu.memory_space<vmem>>, vector<1x128xbf16>
    %29 = arith.extf %28 : vector<1x128xbf16> to vector<1x128xf32>
    %30 = vector.broadcast %29 : vector<1x128xf32> to vector<256x128xf32>
    %31 = arith.addf %27, %30 : vector<256x128xf32>
    %cst_17 = arith.constant 0.000000e+00 : f32
    %32 = vector.broadcast %cst_17 : f32 to vector<256x128xf32>
    %33 = arith.maximumf %31, %32 : vector<256x128xf32>
    %34 = arith.truncf %33 : vector<256x128xf32> to vector<256x128xbf16>
    %c0_18 = arith.constant 0 : index
    %c0_19 = arith.constant 0 : index
    %35 = vector.load %arg8[%c0_18, %c0_19] : memref<128x128xbf16, #tpu.memory_space<vmem>>, vector<128x128xbf16>
    %cst_20 = arith.constant dense<0.000000e+00> : vector<256x128xf32>
    %36 = tpu.matmul %34, %35, %cst_20 {dimension_numbers = #tpu.dot_dimension_numbers<[1], [0], [0], [1], [0, 0, 1, 1], [], []>} : vector<256x128xbf16>, vector<128x128xbf16>, vector<256x128xf32> -> vector<256x128xf32>
    %c0_21 = arith.constant 0 : index
    %c0_22 = arith.constant 0 : index
    %37 = vector.load %arg9[%c0_21, %c0_22] : memref<1x128xbf16, #tpu.memory_space<vmem>>, vector<1x128xbf16>
    %38 = arith.extf %37 : vector<1x128xbf16> to vector<1x128xf32>
    %39 = vector.broadcast %38 : vector<1x128xf32> to vector<256x128xf32>
    %40 = arith.addf %36, %39 : vector<256x128xf32>
    %41 = arith.truncf %40 : vector<256x128xf32> to vector<256x128xbf16>
    %c0_23 = arith.constant 0 : index
    %c0_24 = arith.constant 0 : index
    %42 = vector.load %arg10[%c0_23, %c0_24] : memref<256x128xbf16, #tpu.memory_space<vmem>>, vector<256x128xbf16>
    tpu.vector_store %arg10[%c0_23, %c0_24], %41 {strides = array<i32>} : memref<256x128xbf16, #tpu.memory_space<vmem>>, vector<256x128xbf16>,
    return
  }
  func.func @transform_0(%arg0: i32) -> (i32, i32) {
    %c0_i32 = arith.constant 0 : i32
    %c0_i32_0 = arith.constant 0 : i32
    return %arg0, %c0_i32 : i32, i32
  }
  func.func @transform_1(%arg0: i32) -> (i32, i32) {
    %c0_i32 = arith.constant 0 : i32
    %c0_i32_0 = arith.constant 0 : i32
    %c0_i32_1 = arith.constant 0 : i32
    return %c0_i32, %c0_i32_0 : i32, i32
  }
  func.func @transform_2(%arg0: i32) -> (i32, i32) {
    %c0_i32 = arith.constant 0 : i32
    %c0_i32_0 = arith.constant 0 : i32
    %c0_i32_1 = arith.constant 0 : i32
    return %c0_i32, %c0_i32_0 : i32, i32
  }
  func.func @transform_3(%arg0: i32) -> (i32, i32) {
    %c0_i32 = arith.constant 0 : i32
    %c0_i32_0 = arith.constant 0 : i32
    %c0_i32_1 = arith.constant 0 : i32
    return %c0_i32, %c0_i32_0 : i32, i32
  }
  func.func @transform_4(%arg0: i32) -> (i32, i32) {
    %c0_i32 = arith.constant 0 : i32
    %c0_i32_0 = arith.constant 0 : i32
    %c0_i32_1 = arith.constant 0 : i32
    return %c0_i32, %c0_i32_0 : i32, i32
  }
  func.func @transform_5(%arg0: i32) -> (i32, i32) {
    %c0_i32 = arith.constant 0 : i32
    %c0_i32_0 = arith.constant 0 : i32
    %c0_i32_1 = arith.constant 0 : i32
    return %c0_i32, %c0_i32_0 : i32, i32
  }
  func.func @transform_6(%arg0: i32) -> (i32, i32) {
    %c0_i32 = arith.constant 0 : i32
    %c0_i32_0 = arith.constant 0 : i32
    %c0_i32_1 = arith.constant 0 : i32
    return %c0_i32, %c0_i32_0 : i32, i32
  }
  func.func @transform_7(%arg0: i32) -> (i32, i32) {
    %c0_i32 = arith.constant 0 : i32
    %c0_i32_0 = arith.constant 0 : i32
    %c0_i32_1 = arith.constant 0 : i32
    return %c0_i32, %c0_i32_0 : i32, i32
  }
  func.func @transform_8(%arg0: i32) -> (i32, i32) {
    %c0_i32 = arith.constant 0 : i32
    %c0_i32_0 = arith.constant 0 : i32
    %c0_i32_1 = arith.constant 0 : i32
    return %c0_i32, %c0_i32_0 : i32, i32
  }
  func.func @transform_9(%arg0: i32) -> (i32, i32) {
    %c0_i32 = arith.constant 0 : i32
    %c0_i32_0 = arith.constant 0 : i32
    return %arg0, %c0_i32 : i32, i32
  }
}

</mosaic_0001>

<bundles_post_ra>
// kernel: number_encoder_pallas.1
= control target key start
LH: loop header
LB: loop body
LE: loop exit
PB: predicated region body
PF: predicated region fallthrough
CT: control target
= control target key end

     0   :  { %v1905_v0 = vmov 0   ;;  %s2374_s0 = inlined_call_operand.vmem [shape: f32[256,1], index: 0, kind: input, shape index: {}]   ;;  %s2375_s3 = inlined_call_operand.vmem [shape: bf16[128,128], index: 3, kind: input, shape index: {}]   ;;  %s2376_s5 = inlined_call_operand.vmem [shape: bf16[128,128], index: 5, kind: input, shape index: {}]   ;;  %s2377_s1 = inlined_call_operand.vmem [shape: bf16[1,128], index: 1, kind: input, shape index: {}]   ;;  %s2378_s2 = inlined_call_operand.vmem [shape: bf16[1,128], index: 2, kind: input, shape index: {}]   ;;  %s2379_s7 = inlined_call_operand.vmem [shape: bf16[128,128], index: 7, kind: input, shape index: {}]   ;;  %s2380_s4 = inlined_call_operand.vmem [shape: bf16[1,128], index: 4, kind: input, shape index: {}]   ;;  %s2381_s6 = inlined_call_operand.vmem [shape: bf16[1,128], index: 6, kind: input, shape index: {}]   ;;  %s2382_s8 = inlined_call_operand.vmem [shape: bf16[1,128], index: 8, kind: input, shape index: {}]   ;;  %s2383_s9 = inlined_call_operand.vmem [shape: bf16[256,128], index: 9, kind: output, shape index: {}]  }
   0x1   :  { %1810 = vset.pattern.permute.xlu1 %v1905_v0  ;;  %1799 = vset.pattern.permute.xlu0 %v1905_v0  ;;  %v37_v1 = vld [vmem:[%s2374_s0 + $0x20] sm:$0xff]  ;;  %v38_v2 = vld [vmem:[%s2374_s0 + $0x28] sm:$0xff]  ;;  %v39_v7 = vld [vmem:[%s2374_s0 + $0x30] sm:$0xff] }
   0x2   :  { %v33_v3 = vld [vmem:[%s2374_s0] sm:$0xff]  ;;  %v70_v4 = vmul.f32 0.01, %v37_v1  ;;  %v71_v5 = vmul.f32 0.01, %v38_v2  ;;  %v34_v6 = vld [vmem:[%s2374_s0 + $0x8] sm:$0xff] }
   0x3   :  { %v66_v8 = vmul.f32 0.01, %v33_v3  ;;  %v67_v9 = vmul.f32 0.01, %v34_v6  ;;  %v40_v10 = vld [vmem:[%s2374_s0 + $0x38] sm:$0xff]  ;;  %v35_v11 = vld [vmem:[%s2374_s0 + $0x10] sm:$0xff] }
   0x4   :  { %v72_v12 = vmul.f32 0.01, %v39_v7  ;;  %v73_v13 = vmul.f32 0.01, %v40_v10  ;;  %v36_v14 = vld [vmem:[%s2374_s0 + $0x18] sm:$0xff]  ;;  %v43_v15 = vld [vmem:[%s2374_s0 + $0x50] sm:$0xff]  ;;  %v1811_v25 = vpack.i.bf16 %v71_v5, %v70_v4 }
   0x5   :  { %v68_v16 = vmul.f32 0.01, %v35_v11  ;;  %v69_v17 = vmul.f32 0.01, %v36_v14  ;;  %v44_v18 = vld [vmem:[%s2374_s0 + $0x58] sm:$0xff]  ;;  %v41_v19 = vld [vmem:[%s2374_s0 + $0x40] sm:$0xff]  ;;  %v1800_v30 = vpack.i.bf16 %v67_v9, %v66_v8 }
   0x6   :  { %v76_v20 = vmul.f32 0.01, %v43_v15  ;;  %v77_v21 = vmul.f32 0.01, %v44_v18  ;;  %v42_v22 = vld [vmem:[%s2374_s0 + $0x48] sm:$0xff]  ;;  %v47_v23 = vld [vmem:[%s2374_s0 + $0x70] sm:$0xff]  ;;  %1812 = vperm.xlu1 %1810, %v1811_v25   ;;  %v1816_v34 = vpack.i.bf16 %v73_v13, %v72_v12 }
   0x7   :  { %v48_v24 = vld [vmem:[%s2374_s0 + $0x78] sm:$0xff]  ;;  %v74_v26 = vmul.f32 0.01, %v41_v19  ;;  %v45_v27 = vld [vmem:[%s2374_s0 + $0x60] sm:$0xff]  ;;  %v46_v28 = vld [vmem:[%s2374_s0 + $0x68] sm:$0xff]  ;;  %1801 = vperm.xlu0 %1799, %v1800_v30   ;;  %v1805_v38 = vpack.i.bf16 %v69_v17, %v68_v16 }
   0x8   :  { %v51_v29 = vld [vmem:[%s2374_s0 + $0x90] sm:$0xff]  ;;  %v52_v31 = vld [vmem:[%s2374_s0 + $0x98] sm:$0xff]  ;;  %v49_v32 = vld [vmem:[%s2374_s0 + $0x80] sm:$0xff]  ;;  %v75_v35 = vmul.f32 0.01, %v42_v22  ;;  %v1826_v45 = vpack.i.bf16 %v77_v21, %v76_v20 }
   0x9   :  { %v50_v33 = vld [vmem:[%s2374_s0 + $0x88] sm:$0xff]  ;;  %v80_v36 = vmul.f32 0.01, %v47_v23  ;;  %v81_v37 = vmul.f32 0.01, %v48_v24  ;;  %v55_v40 = vld [vmem:[%s2374_s0 + $0xb0] sm:$0xff] }
   0xa   :  { %v78_v39 = vmul.f32 0.01, %v45_v27  ;;  %v79_v41 = vmul.f32 0.01, %v46_v28  ;;  %v84_v42 = vmul.f32 0.01, %v51_v29  ;;  %1817 = vperm.xlu1 %1810, %v1816_v34   ;;  %v1821_v54 = vpack.i.bf16 %v75_v35, %v74_v26 }
   0xb   :  { %v56_v43 = vld [vmem:[%s2374_s0 + $0xb8] sm:$0xff]  ;;  %v53_v44 = vld [vmem:[%s2374_s0 + $0xa0] sm:$0xff]  ;;  %v85_v46 = vmul.f32 0.01, %v52_v31  ;;  %v82_v47 = vmul.f32 0.01, %v49_v32  ;;  %1806 = vperm.xlu0 %1799, %v1805_v38   ;;  %v1836_v55 = vpack.i.bf16 %v81_v37, %v80_v36  ;;  %v308_v26 = vlaneseq }
   0xc   :  { %v83_v48 = vmul.f32 0.01, %v50_v33  ;;  %v54_v49 = vld [vmem:[%s2374_s0 + $0xa8] sm:$0xff]  ;;  %v59_v50 = vld [vmem:[%s2374_s0 + $0xd0] sm:$0xff]  ;;  %v88_v51 = vmul.f32 0.01, %v55_v40  ;;  %v1831_v0 = vpack.i.bf16 %v79_v41, %v78_v39 }
   0xd   :  { %v60_v52 = vld [vmem:[%s2374_s0 + $0xd8] sm:$0xff]  ;;  %v1881_v53 = vld [vmem:[%s2375_s3] sm:$0xff]   ;;  %v89_v56 = vmul.f32 0.01, %v56_v43  ;;  %v86_v57 = vmul.f32 0.01, %v53_v44  ;;  %v1846_v5 = vpack.i.bf16 %v85_v46, %v84_v42 }
   0xe   :  { %v57_v58 = vld [vmem:[%s2374_s0 + $0xc0] sm:$0xff]  ;;  %v58_v59 = vld [vmem:[%s2374_s0 + $0xc8] sm:$0xff]  ;;  %v63_v60 = vld [vmem:[%s2374_s0 + $0xf0] sm:$0xff]  ;;  %1638 = vmatprep.subr.bf16.mxu0 %v1881_v53  ;;  %1782 = vmatprep.subr.bf16.mxu1 %v1881_v53  ;;  %v87_v63 = vmul.f32 0.01, %v54_v49  ;;  %v1841_v6 = vpack.i.bf16 %v83_v48, %v82_v47  ;;  %v309_v27 = vshrl.u32 %v308_v26, 7 }
   0xf   :  { %v64_v61 = vld [vmem:[%s2374_s0 + $0xf8] sm:$0xff]  ;;  %v1882_v62 = vld [vmem:[%s2375_s3 + $0x8] sm:$0xff]   ;;  %1827 = vperm.xlu1 %1810, %v1826_v45   ;;  %1639 = vmatpush3.bf16.msra.mxu0 %v1881_v53  ;;  %v92_v1 = vmul.f32 0.01, %v59_v50  ;;  %v93_v2 = vmul.f32 0.01, %v60_v52  ;;  %v1856_v15 = vpack.i.bf16 %v89_v56, %v88_v51 }
  0x10   :  { %1822 = vperm.xlu0 %1799, %v1821_v54   ;;  %v61_v3 = vld [vmem:[%s2374_s0 + $0xe0] sm:$0xff]  ;;  %1640 = vmatprep.subr.bf16.mxu0 %v1882_v62  ;;  %v1883_v4 = vld [vmem:[%s2375_s3 + $0x10] sm:$0xff]   ;;  %v90_v7 = vmul.f32 0.01, %v57_v58  ;;  %v91_v8 = vmul.f32 0.01, %v58_v59  ;;  %v1851_v16 = vpack.i.bf16 %v87_v63, %v86_v57 }
  0x11   :  { %1790 = vmatpush3.bf16.msra.mxu1 %v1881_v53  ;;  %v62_v9 = vld [vmem:[%s2374_s0 + $0xe8] sm:$0xff]  ;;  %v96_v10 = vmul.f32 0.01, %v63_v60  ;;  %v97_v11 = vmul.f32 0.01, %v64_v61  ;;  %v1884_v13 = vld [vmem:[%s2375_s3 + $0x18] sm:$0xff]   ;;  %v1866_v18 = vpack.i.bf16 %v93_v2, %v92_v1 }
  0x12   :  { %1783 = vmatprep.subr.bf16.mxu1 %v1882_v62  ;;  %v94_v12 = vmul.f32 0.01, %v61_v3  ;;  %v95_v14 = vmul.f32 0.01, %v62_v9  ;;  %v1885_v17 = vld [vmem:[%s2375_s3 + $0x20] sm:$0xff]   ;;  %v1861_v19 = vpack.i.bf16 %v91_v8, %v90_v7  ;;  %v1886_v20 = vld [vmem:[%s2375_s3 + $0x28] sm:$0xff]  }
  0x13   :  { %1837 = vperm.xlu1 %1810, %v1836_v55   ;;  %1641 = vmatpush3.bf16.msra.mxu0 %v1882_v62  ;;  %v1876_v21 = vpack.i.bf16 %v97_v11, %v96_v10  ;;  %v1887_v23 = vld [vmem:[%s2375_s3 + $0x30] sm:$0xff]   ;;  %v1888_v24 = vld [vmem:[%s2375_s3 + $0x38] sm:$0xff]   ;;  %v2079_v25 = vld [vmem:[%s2376_s5] sm:$0xff]   ;;  %v2088_v31 = vsub.s32 0, %v309_v27 }
  0x14   :  { %1832 = vperm.xlu0 %1799, %v1831_v0   ;;  %1642 = vmatprep.subr.bf16.mxu0 %v1883_v4  ;;  %v1871_v22 = vpack.i.bf16 %v95_v14, %v94_v12  ;;  %v146_v28 = vld [vmem:[%s2377_s1] sm:$0x1] }
  0x15   :  { %1791 = vmatpush3.bf16.msra.mxu1 %v1882_v62  ;;  %v344_v29 = vld [vmem:[%s2378_s2] sm:$0x1]  ;;  %v147_v30 = vunpack.c.l.bf16 %v146_v28 }
  0x16   :  { %1784 = vmatprep.subr.bf16.mxu1 %v1883_v4  ;;  %v345_v32 = vunpack.c.l.bf16 %v344_v29 }
  0x17   :  { %1847 = vperm.xlu1 %1810, %v1846_v5   ;;  %1643 = vmatpush3.bf16.msra.mxu0 %v1883_v4  ;;  %v2091_v33 = vrot.slane %v147_v30, %v2088_v31 }
  0x18   :  { %1842 = vperm.xlu0 %1799, %v1841_v6   ;;  %1644 = vmatprep.subr.bf16.mxu0 %v1884_v13  ;;  %v2094_v38 = vrot.slane %v345_v32, %v2088_v31 }
  0x19   :  { %1792 = vmatpush3.bf16.msra.mxu1 %v1883_v4 }
  0x1a   :  { %1785 = vmatprep.subr.bf16.mxu1 %v1884_v13 }
  0x1b   :  { %1857 = vperm.xlu1 %1810, %v1856_v15   ;;  %1645 = vmatpush3.bf16.msra.mxu0 %v1884_v13 }
  0x1c   :  { %1852 = vperm.xlu0 %1799, %v1851_v16   ;;  %1646 = vmatprep.subr.bf16.mxu0 %v1885_v17 }
  0x1d   :  { %1793 = vmatpush3.bf16.msra.mxu1 %v1884_v13 }
  0x1e   :  { %1786 = vmatprep.subr.bf16.mxu1 %v1885_v17 }
  0x1f   :  { %1867 = vperm.xlu1 %1810, %v1866_v18   ;;  %1647 = vmatpush3.bf16.msra.mxu0 %v1885_v17 }
  0x20   :  { %1862 = vperm.xlu0 %1799, %v1861_v19   ;;  %1648 = vmatprep.subr.bf16.mxu0 %v1886_v20 }
  0x21   :  { %1794 = vmatpush3.bf16.msra.mxu1 %v1885_v17 }
  0x22   :  { %1787 = vmatprep.subr.bf16.mxu1 %v1886_v20 }
  0x23   :  { %1877 = vperm.xlu1 %1810, %v1876_v21   ;;  %1649 = vmatpush3.bf16.msra.mxu0 %v1886_v20 }
  0x24   :  { %1872 = vperm.xlu0 %1799, %v1871_v22   ;;  %1650 = vmatprep.subr.bf16.mxu0 %v1887_v23 }
  0x25   :  { %1795 = vmatpush3.bf16.msra.mxu1 %v1886_v20 }
  0x26   :  { %1788 = vmatprep.subr.bf16.mxu1 %v1887_v23 }
  0x27   :  { %1651 = vmatpush3.bf16.msra.mxu0 %v1887_v23 }
  0x28   :  { %1652 = vmatprep.subr.bf16.mxu0 %v1888_v24 }
  0x29   :  { %1796 = vmatpush3.bf16.msra.mxu1 %v1887_v23 }
  0x2a   :  { %1789 = vmatprep.subr.bf16.mxu1 %v1888_v24 }
  0x2b   :  { %1653 = vmatpush3.bf16.msra.mxu0 %v1888_v24 }
  0x2d   :  { %1797 = vmatpush3.bf16.msra.mxu1 %v1888_v24 }
  0x2e   :  { %1686 = vmatprep.subr.bf16.mxu1 %v2079_v25 }
  0x85   :  { %v1813_v34 = vpop.permute.xlu1 %1812 }
  0x86   :  { %v1815_v35 = vunpack.i.h.bf16 %v1813_v34  ;;  %v1814_v36 = vunpack.i.l.bf16 %v1813_v34  ;;  %v1802_v37 = vpop.permute.xlu0 %1801 }
  0x87   :  { %v1804_v39 = vunpack.i.h.bf16 %v1802_v37  ;;  %v1803_v40 = vunpack.i.l.bf16 %v1802_v37 }
  0x88   :  { %v317_v41 = vmul.f32 %v1815_v35, %v2091_v33  ;;  %v316_v42 = vmul.f32 %v1814_v36, %v2091_v33 }
  0x89   :  { %v313_v43 = vmul.f32 %v1804_v39, %v2091_v33  ;;  %v312_v44 = vmul.f32 %v1803_v40, %v2091_v33  ;;  %v1818_v45 = vpop.permute.xlu1 %1817 }
  0x8a   :  { %v355_v46 = vadd.f32 %v2094_v38, %v317_v41  ;;  %v354_v47 = vadd.f32 %v2094_v38, %v316_v42  ;;  %v1820_v48 = vunpack.i.h.bf16 %v1818_v45  ;;  %v1819_v49 = vunpack.i.l.bf16 %v1818_v45  ;;  %v1807_v50 = vpop.permute.xlu0 %1806 }
  0x8b   :  { %v1809_v51 = vunpack.i.h.bf16 %v1807_v50  ;;  %v1808_v52 = vunpack.i.l.bf16 %v1807_v50  ;;  %v350_v53 = vadd.f32 %v2094_v38, %v312_v44  ;;  %v351_v54 = vadd.f32 %v2094_v38, %v313_v43 }
  0x8c   :  { %v319_v55 = vmul.f32 %v1820_v48, %v2091_v33  ;;  %v318_v56 = vmul.f32 %v1819_v49, %v2091_v33  ;;  %v386_v1 = vmax.f32 %v354_v47, 0.0  ;;  %v387_v2 = vmax.f32 %v355_v46, 0.0 }
  0x8d   :  { %v315_v57 = vmul.f32 %v1809_v51, %v2091_v33  ;;  %v314_v58 = vmul.f32 %v1808_v52, %v2091_v33  ;;  %v382_v60 = vmax.f32 %v350_v53, 0.0  ;;  %v383_v61 = vmax.f32 %v351_v54, 0.0 }
  0x8e   :  { %v1828_v59 = vpop.permute.xlu1 %1827  ;;  %v357_v16 = vadd.f32 %v2094_v38, %v319_v55  ;;  %v356_v17 = vadd.f32 %v2094_v38, %v318_v56  ;;  %v416_v18 = vpack.c.bf16 %v387_v2, %v386_v1 }
  0x8f   :  { %v1830_v62 = vunpack.i.h.bf16 %v1828_v59  ;;  %v1829_v63 = vunpack.i.l.bf16 %v1828_v59  ;;  %v1823_v0 = vpop.permute.xlu0 %1822  ;;  %v353_v3 = vadd.f32 %v2094_v38, %v315_v57  ;;  %v352_v4 = vadd.f32 %v2094_v38, %v314_v58 }
  0x90   :  { %v1825_v5 = vunpack.i.h.bf16 %v1823_v0  ;;  %v1824_v6 = vunpack.i.l.bf16 %v1823_v0  ;;  %v414_v9 = vpack.c.bf16 %v383_v61, %v382_v60  ;;  %v388_v37 = vmax.f32 %v356_v17, 0.0 }
  0x91   :  { %v323_v7 = vmul.f32 %v1830_v62, %v2091_v33  ;;  %v322_v8 = vmul.f32 %v1829_v63, %v2091_v33  ;;  %v384_v13 = vmax.f32 %v352_v4, 0.0  ;;  %v385_v14 = vmax.f32 %v353_v3, 0.0 }
  0x92   :  { %v321_v10 = vmul.f32 %v1825_v5, %v2091_v33  ;;  %v320_v11 = vmul.f32 %v1824_v6, %v2091_v33  ;;  %v1838_v12 = vpop.permute.xlu1 %1837  ;;  %1654 = vmatprep.mubr.bf16.mxu0 %v414_v9  ;;  %v389_v39 = vmax.f32 %v357_v16, 0.0 }
  0x93   :  { %v1833_v15 = vpop.permute.xlu0 %1832  ;;  %v415_v21 = vpack.c.bf16 %v385_v14, %v384_v13  ;;  %v2119_v22 = vadd.f32 %v2094_v38, %v323_v7  ;;  %v2122_v23 = vadd.f32 %v2094_v38, %v322_v8  ;;  %v1840_v24 = vunpack.i.h.bf16 %v1838_v12 }
  0x94   :  { %v359_v19 = vadd.f32 %v2094_v38, %v321_v10  ;;  %v358_v20 = vadd.f32 %v2094_v38, %v320_v11  ;;  %v1835_v26 = vunpack.i.h.bf16 %v1833_v15  ;;  %v1839_v28 = vunpack.i.l.bf16 %v1838_v12 }
  0x95   :  { %v1834_v29 = vunpack.i.l.bf16 %v1833_v15  ;;  %1655 = vmatmul.mubr.bf16.vlgmr.msra.gmra.mrb[0].mxu0 %v415_v21  ;;  %v327_v44 = vmul.f32 %v1840_v24, %v2091_v33  ;;  %v417_v59 = vpack.c.bf16 %v389_v39, %v388_v37  ;;  %v392_v6 = vmax.f32 %v2122_v23, 0.0 }
  0x96   :  { %v1848_v27 = vpop.permute.xlu1 %1847  ;;  %1658 = vmatprep.mubr.bf16.mxu0 %v416_v18  ;;  %v390_v42 = vmax.f32 %v358_v20, 0.0  ;;  %v391_v43 = vmax.f32 %v359_v19, 0.0  ;;  %v325_v45 = vmul.f32 %v1835_v26, %v2091_v33  ;;  %v326_v2 = vmul.f32 %v1839_v28, %v2091_v33 }
  0x97   :  { %v1850_v30 = vunpack.i.h.bf16 %v1848_v27  ;;  %v1849_v32 = vunpack.i.l.bf16 %v1848_v27  ;;  %v1843_v34 = vpop.permute.xlu0 %1842  ;;  %v324_v54 = vmul.f32 %v1834_v29, %v2091_v33  ;;  %v393_v11 = vmax.f32 %v2119_v22, 0.0 }
  0x98   :  { %v1845_v35 = vunpack.i.h.bf16 %v1843_v34  ;;  %v1844_v36 = vunpack.i.l.bf16 %v1843_v34  ;;  %v418_v60 = vpack.c.bf16 %v391_v43, %v390_v42  ;;  %v363_v12 = vadd.f32 %v2094_v38, %v325_v45 }
  0x99   :  { %v331_v40 = vmul.f32 %v1850_v30, %v2091_v33  ;;  %v330_v41 = vmul.f32 %v1849_v32, %v2091_v33  ;;  %v362_v13 = vadd.f32 %v2094_v38, %v324_v54  ;;  %v419_v29 = vpack.c.bf16 %v393_v11, %v392_v6  ;;  %v1890_v30 = vld [vmem:[%s2376_s5 + $0x8] sm:$0xff]   ;;  %v1893_v6 = vld [vmem:[%s2376_s5 + $0x20] sm:$0xff]  }
  0x9a   :  { %v329_v46 = vmul.f32 %v1845_v35, %v2091_v33  ;;  %v328_v47 = vmul.f32 %v1844_v36, %v2091_v33  ;;  %v1858_v48 = vpop.permute.xlu1 %1857  ;;  %v365_v37 = vadd.f32 %v2094_v38, %v327_v44  ;;  %v364_v39 = vadd.f32 %v2094_v38, %v326_v2  ;;  %v1891_v44 = vld [vmem:[%s2376_s5 + $0x10] sm:$0xff]  }
  0x9b   :  { %v369_v49 = vadd.f32 %v2094_v38, %v331_v40  ;;  %v368_v50 = vadd.f32 %v2094_v38, %v330_v41  ;;  %v1860_v51 = vunpack.i.h.bf16 %v1858_v48  ;;  %v1859_v52 = vunpack.i.l.bf16 %v1858_v48  ;;  %v1853_v53 = vpop.permute.xlu0 %1852 }
  0x9c   :  { %v1855_v55 = vunpack.i.h.bf16 %v1853_v53  ;;  %v1854_v56 = vunpack.i.l.bf16 %v1853_v53  ;;  %v366_v57 = vadd.f32 %v2094_v38, %v328_v47  ;;  %v367_v61 = vadd.f32 %v2094_v38, %v329_v46 }
  0x9d   :  { %v335_v58 = vmul.f32 %v1860_v51, %v2091_v33  ;;  %v400_v0 = vmax.f32 %v368_v50, 0.0  ;;  %v401_v1 = vmax.f32 %v369_v49, 0.0  ;;  %v334_v3 = vmul.f32 %v1859_v52, %v2091_v33  ;;  %1659 = vmatmul.mubr.bf16.gmra.mrb[4].mxu0 %v417_v59 }
  0x9e   :  { %v333_v62 = vmul.f32 %v1855_v55, %v2091_v33  ;;  %v332_v63 = vmul.f32 %v1854_v56, %v2091_v33  ;;  %v398_v5 = vmax.f32 %v366_v57, 0.0  ;;  %v1868_v8 = vpop.permute.xlu1 %1867  ;;  %1662 = vmatprep.mubr.bf16.mxu0 %v418_v60  ;;  %v399_v15 = vmax.f32 %v367_v61, 0.0 }
  0x9f   :  { %v1863_v4 = vpop.permute.xlu0 %1862  ;;  %v373_v16 = vadd.f32 %v2094_v38, %v335_v58  ;;  %v423_v19 = vpack.c.bf16 %v401_v1, %v400_v0  ;;  %v372_v20 = vadd.f32 %v2094_v38, %v334_v3  ;;  %v1870_v21 = vunpack.i.h.bf16 %v1868_v8 }
  0xa0   :  { %v370_v7 = vadd.f32 %v2094_v38, %v332_v63  ;;  %v1865_v9 = vunpack.i.h.bf16 %v1863_v4  ;;  %v1864_v10 = vunpack.i.l.bf16 %v1863_v4  ;;  %v371_v14 = vadd.f32 %v2094_v38, %v333_v62  ;;  %v1892_v63 = vld [vmem:[%s2376_s5 + $0x18] sm:$0xff]  }
  0xa1   :  { %v422_v23 = vpack.c.bf16 %v399_v15, %v398_v5  ;;  %v1869_v26 = vunpack.i.l.bf16 %v1868_v8  ;;  %v394_v36 = vmax.f32 %v362_v13, 0.0  ;;  %v395_v40 = vmax.f32 %v363_v12, 0.0  ;;  %v1897_v15 = vld [vmem:[%s2379_s7] sm:$0xff]  }
  0xa2   :  { %v337_v17 = vmul.f32 %v1865_v9, %v2091_v33  ;;  %v336_v18 = vmul.f32 %v1864_v10, %v2091_v33  ;;  %v402_v22 = vmax.f32 %v370_v7, 0.0  ;;  %v403_v35 = vmax.f32 %v371_v14, 0.0  ;;  %v1878_v48 = vpop.permute.xlu1 %1877  ;;  %v1896_v14 = vld [vmem:[%s2376_s5 + $0x38] sm:$0xff]   ;;  %1734 = vmatprep.subr.bf16.mxu0 %v1897_v15 }
  0xa3   :  { %v1873_v24 = vpop.permute.xlu0 %1872  ;;  %1670 = vmatprep.mubr.bf16.mxu1 %v422_v23  ;;  %v339_v41 = vmul.f32 %v1870_v21, %v2091_v33  ;;  %v338_v43 = vmul.f32 %v1869_v26, %v2091_v33  ;;  %v420_v45 = vpack.c.bf16 %v395_v40, %v394_v36  ;;  %v404_v46 = vmax.f32 %v372_v20, 0.0  ;;  %1735 = vmatpush3.bf16.msra.mxu0 %v1897_v15  ;;  %v1902_v20 = vld [vmem:[%s2379_s7 + $0x28] sm:$0xff]   ;;  %v446_v21 = vld [vmem:[%s2380_s4] sm:$0x1] }
  0xa4   :  { %v375_v27 = vadd.f32 %v2094_v38, %v337_v17  ;;  %v374_v28 = vadd.f32 %v2094_v38, %v336_v18  ;;  %v1875_v32 = vunpack.i.h.bf16 %v1873_v24  ;;  %v1874_v34 = vunpack.i.l.bf16 %v1873_v24  ;;  %1671 = vmatmul.mubr.bf16.vlgmr.msra.gmra.mrb[0].mxu1 %v423_v19  ;;  %v1899_v17 = vld [vmem:[%s2379_s7 + $0x10] sm:$0xff]   ;;  %v1900_v18 = vld [vmem:[%s2379_s7 + $0x18] sm:$0xff]   ;;  %v1901_v19 = vld [vmem:[%s2379_s7 + $0x20] sm:$0xff]  }
  0xa5   :  { %1663 = vmatmul.mubr.bf16.gmra.mrb[8].mxu0 %v419_v29  ;;  %v424_v42 = vpack.c.bf16 %v403_v35, %v402_v22  ;;  %1687 = vmatpush3.bf16.msra.mxu1 %v2079_v25  ;;  %v405_v47 = vmax.f32 %v373_v16, 0.0  ;;  %v396_v25 = vmax.f32 %v364_v39, 0.0  ;;  %v397_v53 = vmax.f32 %v365_v37, 0.0  ;;  %v1898_v16 = vld [vmem:[%s2379_s7 + $0x8] sm:$0xff]  }
  0xa6   :  { %1688 = vmatprep.subr.bf16.mxu1 %v1890_v30  ;;  %v341_v49 = vmul.f32 %v1875_v32, %v2091_v33  ;;  %v340_v50 = vmul.f32 %v1874_v34, %v2091_v33  ;;  %v406_v51 = vmax.f32 %v374_v28, 0.0  ;;  %v407_v52 = vmax.f32 %v375_v27, 0.0  ;;  %1666 = vmatprep.mubr.bf16.mxu0 %v420_v45 }
  0xa7   :  { %1674 = vmatprep.mubr.bf16.mxu1 %v424_v42  ;;  %v377_v54 = vadd.f32 %v2094_v38, %v339_v41  ;;  %v376_v55 = vadd.f32 %v2094_v38, %v338_v43  ;;  %v1880_v56 = vunpack.i.h.bf16 %v1878_v48  ;;  %v1879_v57 = vunpack.i.l.bf16 %v1878_v48  ;;  %1736 = vmatprep.subr.bf16.mxu0 %v1898_v16 }
  0xa8   :  { %v425_v58 = vpack.c.bf16 %v405_v47, %v404_v46  ;;  %v379_v59 = vadd.f32 %v2094_v38, %v341_v49  ;;  %v378_v60 = vadd.f32 %v2094_v38, %v340_v50  ;;  %v426_v61 = vpack.c.bf16 %v407_v52, %v406_v51  ;;  %1737 = vmatpush3.bf16.msra.mxu0 %v1898_v16 }
  0xa9   :  { %1689 = vmatpush3.bf16.msra.mxu1 %v1890_v30  ;;  %v421_v62 = vpack.c.bf16 %v397_v53, %v396_v25  ;;  %v343_v0 = vmul.f32 %v1880_v56, %v2091_v33  ;;  %v342_v1 = vmul.f32 %v1879_v57, %v2091_v33  ;;  %v408_v2 = vmax.f32 %v376_v55, 0.0  ;;  %v1894_v33 = vld [vmem:[%s2376_s5 + $0x28] sm:$0xff]   ;;  %1738 = vmatprep.subr.bf16.mxu0 %v1899_v17 }
  0xaa   :  { %1690 = vmatprep.subr.bf16.mxu1 %v1891_v44  ;;  %v409_v3 = vmax.f32 %v377_v54, 0.0  ;;  %v411_v4 = vmax.f32 %v379_v59, 0.0  ;;  %v410_v5 = vmax.f32 %v378_v60, 0.0  ;;  %v447_v23 = vunpack.c.l.bf16 %v446_v21 }
  0xab   :  { %v381_v7 = vadd.f32 %v2094_v38, %v343_v0  ;;  %v380_v8 = vadd.f32 %v2094_v38, %v342_v1  ;;  %v1895_v38 = vld [vmem:[%s2376_s5 + $0x30] sm:$0xff]  }
  0xac   :  { %1675 = vmatmul.mubr.bf16.gmra.mrb[4].mxu1 %v425_v58  ;;  %v427_v9 = vpack.c.bf16 %v409_v3, %v408_v2  ;;  %v428_v10 = vpack.c.bf16 %v411_v4, %v410_v5  ;;  %1739 = vmatpush3.bf16.msra.mxu0 %v1899_v17  ;;  %v2210_v24 = vrot.slane %v447_v23, %v2088_v31 }
  0xad   :  { %1678 = vmatprep.mubr.bf16.mxu1 %v426_v61  ;;  %1667 = vmatmul.mubr.bf16.gmra.mrb[12].mxu0 %v421_v62  ;;  %v413_v11 = vmax.f32 %v381_v7, 0.0  ;;  %v412_v12 = vmax.f32 %v380_v8, 0.0 }
  0xae   :  { %1691 = vmatpush3.bf16.msra.mxu1 %v1891_v44  ;;  %1740 = vmatprep.subr.bf16.mxu0 %v1900_v18 }
  0xaf   :  { %1692 = vmatprep.subr.bf16.mxu1 %v1892_v63  ;;  %v429_v13 = vpack.c.bf16 %v413_v11, %v412_v12 }
  0xb0   :  { %1741 = vmatpush3.bf16.msra.mxu0 %v1900_v18 }
  0xb1   :  { %1742 = vmatprep.subr.bf16.mxu0 %v1901_v19 }
  0xb2   :  { %1693 = vmatpush3.bf16.msra.mxu1 %v1892_v63 }
  0xb3   :  { %1694 = vmatprep.subr.bf16.mxu1 %v1893_v6 }
  0xb4   :  { %1679 = vmatmul.mubr.bf16.gmra.mrb[8].mxu1 %v427_v9  ;;  %1743 = vmatpush3.bf16.msra.mxu0 %v1901_v19 }
  0xb5   :  { %1682 = vmatprep.mubr.bf16.mxu1 %v428_v10  ;;  %1744 = vmatprep.subr.bf16.mxu0 %v1902_v20 }
  0xb6   :  { %1695 = vmatpush3.bf16.msra.mxu1 %v1893_v6 }
  0xb7   :  { %1696 = vmatprep.subr.bf16.mxu1 %v1894_v33 }
  0xb8   :  { %1745 = vmatpush3.bf16.msra.mxu0 %v1902_v20 }
  0xba   :  { %1697 = vmatpush3.bf16.msra.mxu1 %v1894_v33 }
  0xbb   :  { %1698 = vmatprep.subr.bf16.mxu1 %v1895_v38 }
  0xbc   :  { %1683 = vmatmul.mubr.bf16.gmra.mrb[12].mxu1 %v429_v13 }
  0xbe   :  { %1699 = vmatpush3.bf16.msra.mxu1 %v1895_v38 }
  0xbf   :  { %1700 = vmatprep.subr.bf16.mxu1 %v1896_v14 }
  0xc2   :  { %1701 = vmatpush3.bf16.msra.mxu1 %v1896_v14 }
 0x168   :  { %v1656_v22 = vpop.f32.mrb[0].mxu0 }
 0x169   :  { %v543_v26 = vadd.f32 %v1656_v22, %v2210_v24  ;;  %v534_v27 = vpop.f32.mrb[1].mxu0 }
 0x16a   :  { %v535_v28 = vadd.f32 %v534_v27, %v2210_v24  ;;  %v1657_v29 = vpop.f32.mrb[2].mxu0 }
 0x16b   :  { %v546_v30 = vadd.f32 %v1657_v29, %v2210_v24  ;;  %v537_v32 = vpop.f32.mrb[3].mxu0  ;;  %v663_v35 = vmax.f32 %v543_v26, 0.0 }
 0x16c   :  { %v538_v34 = vadd.f32 %v537_v32, %v2210_v24  ;;  %v661_v37 = vmax.f32 %v535_v28, 0.0 }
 0x16d   :  { %v664_v36 = vmax.f32 %v546_v30, 0.0 }
 0x16e   :  { %v662_v39 = vmax.f32 %v538_v34, 0.0 }
 0x16f   :  { %v694_v40 = vpack.c.bf16 %v664_v36, %v663_v35 }
 0x170   :  { %v693_v41 = vpack.c.bf16 %v662_v39, %v661_v37  ;;  %v1660_v42 = vpop.f32.mrb[4].mxu0 }
 0x171   :  { %v559_v43 = vadd.f32 %v1660_v42, %v2210_v24  ;;  %v550_v45 = vpop.f32.mrb[5].mxu0 }
 0x172   :  { %v551_v46 = vadd.f32 %v550_v45, %v2210_v24  ;;  %v1661_v47 = vpop.f32.mrb[6].mxu0  ;;  %1702 = vmatprep.mubr.bf16.mxu1 %v693_v41 }
 0x173   :  { %v562_v44 = vadd.f32 %v1661_v47, %v2210_v24  ;;  %v553_v48 = vpop.f32.mrb[7].mxu0  ;;  %1703 = vmatmul.mubr.bf16.vlgmr.msra.gmra.mrb[16].mxu1 %v694_v40  ;;  %v667_v50 = vmax.f32 %v559_v43, 0.0 }
 0x174   :  { %v554_v49 = vadd.f32 %v553_v48, %v2210_v24  ;;  %v665_v52 = vmax.f32 %v551_v46, 0.0 }
 0x175   :  { %v668_v51 = vmax.f32 %v562_v44, 0.0 }
 0x176   :  { %v666_v25 = vmax.f32 %v554_v49, 0.0 }
 0x177   :  { %v696_v53 = vpack.c.bf16 %v668_v51, %v667_v50  ;;  %v1672_v54 = vpop.f32.mrb[0].mxu1 }
 0x178   :  { %v695_v55 = vpack.c.bf16 %v666_v25, %v665_v52  ;;  %v607_v56 = vadd.f32 %v1672_v54, %v2210_v24  ;;  %v598_v57 = vpop.f32.mrb[1].mxu1  ;;  %v1664_v58 = vpop.f32.mrb[8].mxu0 }
 0x179   :  { %v599_v59 = vadd.f32 %v598_v57, %v2210_v24  ;;  %v1673_v60 = vpop.f32.mrb[2].mxu1  ;;  %v575_v61 = vadd.f32 %v1664_v58, %v2210_v24  ;;  %v566_v62 = vpop.f32.mrb[9].mxu0 }
 0x17a   :  { %v610_v63 = vadd.f32 %v1673_v60, %v2210_v24  ;;  %v601_v0 = vpop.f32.mrb[3].mxu1  ;;  %v567_v1 = vadd.f32 %v566_v62, %v2210_v24  ;;  %v1665_v2 = vpop.f32.mrb[10].mxu0  ;;  %1706 = vmatprep.mubr.bf16.mxu1 %v695_v55  ;;  %v679_v6 = vmax.f32 %v607_v56, 0.0 }
 0x17b   :  { %v602_v3 = vadd.f32 %v601_v0, %v2210_v24  ;;  %v578_v4 = vadd.f32 %v1665_v2, %v2210_v24  ;;  %v569_v5 = vpop.f32.mrb[11].mxu0  ;;  %1707 = vmatmul.mubr.bf16.gmra.mrb[20].mxu1 %v696_v53  ;;  %v677_v9 = vmax.f32 %v599_v59, 0.0  ;;  %v671_v10 = vmax.f32 %v575_v61, 0.0 }
 0x17c   :  { %v680_v7 = vmax.f32 %v610_v63, 0.0  ;;  %v570_v8 = vadd.f32 %v569_v5, %v2210_v24  ;;  %v669_v13 = vmax.f32 %v567_v1, 0.0 }
 0x17d   :  { %v678_v33 = vmax.f32 %v602_v3, 0.0  ;;  %v672_v11 = vmax.f32 %v578_v4, 0.0 }
 0x17e   :  { %v702_v12 = vpack.c.bf16 %v680_v7, %v679_v6  ;;  %v670_v38 = vmax.f32 %v570_v8, 0.0 }
 0x17f   :  { %v701_v14 = vpack.c.bf16 %v678_v33, %v677_v9  ;;  %v698_v15 = vpack.c.bf16 %v672_v11, %v671_v10  ;;  %v1676_v16 = vpop.f32.mrb[4].mxu1 }
 0x180   :  { %v697_v17 = vpack.c.bf16 %v670_v38, %v669_v13  ;;  %v623_v18 = vadd.f32 %v1676_v16, %v2210_v24  ;;  %v614_v19 = vpop.f32.mrb[5].mxu1  ;;  %v1668_v20 = vpop.f32.mrb[12].mxu0  ;;  %v1903_v13 = vld [vmem:[%s2379_s7 + $0x30] sm:$0xff]  }
 0x181   :  { %v615_v21 = vadd.f32 %v614_v19, %v2210_v24  ;;  %v1677_v23 = vpop.f32.mrb[6].mxu1  ;;  %v591_v22 = vadd.f32 %v1668_v20, %v2210_v24  ;;  %v582_v26 = vpop.f32.mrb[13].mxu0  ;;  %1746 = vmatprep.subr.bf16.mxu0 %v1903_v13 }
 0x182   :  { %v626_v27 = vadd.f32 %v1677_v23, %v2210_v24  ;;  %v617_v28 = vpop.f32.mrb[7].mxu1  ;;  %v583_v29 = vadd.f32 %v582_v26, %v2210_v24  ;;  %v1669_v30 = vpop.f32.mrb[14].mxu0  ;;  %1710 = vmatprep.mubr.bf16.mxu1 %v697_v17  ;;  %v683_v36 = vmax.f32 %v623_v18, 0.0  ;;  %1747 = vmatpush3.bf16.msra.mxu0 %v1903_v13 }
 0x183   :  { %v618_v32 = vadd.f32 %v617_v28, %v2210_v24  ;;  %v594_v34 = vadd.f32 %v1669_v30, %v2210_v24  ;;  %v585_v35 = vpop.f32.mrb[15].mxu0  ;;  %1711 = vmatmul.mubr.bf16.gmra.mrb[24].mxu1 %v698_v15  ;;  %v681_v40 = vmax.f32 %v615_v21, 0.0  ;;  %v675_v41 = vmax.f32 %v591_v22, 0.0 }
 0x184   :  { %v684_v37 = vmax.f32 %v626_v27, 0.0  ;;  %v586_v39 = vadd.f32 %v585_v35, %v2210_v24  ;;  %v673_v46 = vmax.f32 %v583_v29, 0.0 }
 0x185   :  { %v682_v42 = vmax.f32 %v618_v32, 0.0  ;;  %v676_v43 = vmax.f32 %v594_v34, 0.0 }
 0x186   :  { %v704_v45 = vpack.c.bf16 %v684_v37, %v683_v36  ;;  %v674_v47 = vmax.f32 %v586_v39, 0.0 }
 0x187   :  { %v703_v44 = vpack.c.bf16 %v682_v42, %v681_v40  ;;  %v700_v48 = vpack.c.bf16 %v676_v43, %v675_v41  ;;  %v1680_v49 = vpop.f32.mrb[8].mxu1 }
 0x188   :  { %v699_v50 = vpack.c.bf16 %v674_v47, %v673_v46  ;;  %v639_v51 = vadd.f32 %v1680_v49, %v2210_v24  ;;  %v630_v52 = vpop.f32.mrb[9].mxu1 }
 0x189   :  { %v631_v25 = vadd.f32 %v630_v52, %v2210_v24  ;;  %v1681_v53 = vpop.f32.mrb[10].mxu1 }
 0x18a   :  { %v642_v54 = vadd.f32 %v1681_v53, %v2210_v24  ;;  %v633_v55 = vpop.f32.mrb[11].mxu1  ;;  %1714 = vmatprep.mubr.bf16.mxu1 %v699_v50  ;;  %v687_v57 = vmax.f32 %v639_v51, 0.0 }
 0x18b   :  { %v634_v56 = vadd.f32 %v633_v55, %v2210_v24  ;;  %1715 = vmatmul.mubr.bf16.gmra.mrb[28].mxu1 %v700_v48  ;;  %v685_v59 = vmax.f32 %v631_v25, 0.0 }
 0x18c   :  { %v688_v58 = vmax.f32 %v642_v54, 0.0  ;;  %1718 = vmatprep.mubr.bf16.mxu1 %v701_v14 }
 0x18d   :  { %v686_v60 = vmax.f32 %v634_v56, 0.0 }
 0x18e   :  { %v706_v61 = vpack.c.bf16 %v688_v58, %v687_v57 }
 0x18f   :  { %v705_v62 = vpack.c.bf16 %v686_v60, %v685_v59  ;;  %v1684_v63 = vpop.f32.mrb[12].mxu1 }
 0x190   :  { %v655_v0 = vadd.f32 %v1684_v63, %v2210_v24  ;;  %v646_v1 = vpop.f32.mrb[13].mxu1 }
 0x191   :  { %v647_v2 = vadd.f32 %v646_v1, %v2210_v24  ;;  %v1685_v3 = vpop.f32.mrb[14].mxu1 }
 0x192   :  { %v658_v4 = vadd.f32 %v1685_v3, %v2210_v24  ;;  %v649_v5 = vpop.f32.mrb[15].mxu1  ;;  %v691_v7 = vmax.f32 %v655_v0, 0.0 }
 0x193   :  { %v650_v6 = vadd.f32 %v649_v5, %v2210_v24  ;;  %1719 = vmatmul.mubr.bf16.gmra.mrb[32].mxu1 %v702_v12  ;;  %v689_v9 = vmax.f32 %v647_v2, 0.0  ;;  %v1904_v24 = vld [vmem:[%s2379_s7 + $0x38] sm:$0xff]   ;;  %v725_v12 = vld [vmem:[%s2381_s6] sm:$0x1] }
 0x194   :  { %v692_v8 = vmax.f32 %v658_v4, 0.0  ;;  %1722 = vmatprep.mubr.bf16.mxu1 %v703_v44  ;;  %1748 = vmatprep.subr.bf16.mxu0 %v1904_v24  ;;  %v726_v38 = vunpack.c.l.bf16 %v725_v12 }
 0x195   :  { %v690_v10 = vmax.f32 %v650_v6, 0.0  ;;  %1749 = vmatpush3.bf16.msra.mxu0 %v1904_v24 }
 0x196   :  { %v708_v33 = vpack.c.bf16 %v692_v8, %v691_v7  ;;  %v2254_v14 = vrot.slane %v726_v38, %v2088_v31 }
 0x197   :  { %v707_v11 = vpack.c.bf16 %v690_v10, %v689_v9 }
 0x19b   :  { %1723 = vmatmul.mubr.bf16.gmra.mrb[36].mxu1 %v704_v45 }
 0x19c   :  { %1726 = vmatprep.mubr.bf16.mxu1 %v705_v62 }
 0x1a3   :  { %1727 = vmatmul.mubr.bf16.gmra.mrb[40].mxu1 %v706_v61 }
 0x1a4   :  { %1730 = vmatprep.mubr.bf16.mxu1 %v707_v11 }
 0x1ab   :  { %1731 = vmatmul.mubr.bf16.gmra.mrb[44].mxu1 %v708_v33 }
 0x246   :  { %v1704_v15 = vpop.f32.mrb[16].mxu1 }
 0x247   :  { %v822_v16 = vadd.f32 %v1704_v15, %v2254_v14  ;;  %v813_v17 = vpop.f32.mrb[17].mxu1 }
 0x248   :  { %v814_v18 = vadd.f32 %v813_v17, %v2254_v14  ;;  %v1705_v19 = vpop.f32.mrb[18].mxu1 }
 0x249   :  { %v825_v20 = vadd.f32 %v1705_v19, %v2254_v14  ;;  %v816_v21 = vpop.f32.mrb[19].mxu1  ;;  %v942_v22 = vmax.f32 %v822_v16, 0.0 }
 0x24a   :  { %v817_v23 = vadd.f32 %v816_v21, %v2254_v14  ;;  %v940_v27 = vmax.f32 %v814_v18, 0.0 }
 0x24b   :  { %v943_v26 = vmax.f32 %v825_v20, 0.0 }
 0x24c   :  { %v941_v28 = vmax.f32 %v817_v23, 0.0 }
 0x24d   :  { %v973_v29 = vpack.c.bf16 %v943_v26, %v942_v22 }
 0x24e   :  { %v972_v30 = vpack.c.bf16 %v941_v28, %v940_v27  ;;  %v1708_v32 = vpop.f32.mrb[20].mxu1 }
 0x24f   :  { %v838_v34 = vadd.f32 %v1708_v32, %v2254_v14  ;;  %v829_v35 = vpop.f32.mrb[21].mxu1 }
 0x250   :  { %v830_v36 = vadd.f32 %v829_v35, %v2254_v14  ;;  %v1709_v37 = vpop.f32.mrb[22].mxu1  ;;  %1750 = vmatprep.mubr.bf16.mxu0 %v972_v30 }
 0x251   :  { %v841_v39 = vadd.f32 %v1709_v37, %v2254_v14  ;;  %v832_v40 = vpop.f32.mrb[23].mxu1  ;;  %1751 = vmatmul.mubr.bf16.vlgmr.msra.gmra.mrb[16].mxu0 %v973_v29  ;;  %v946_v42 = vmax.f32 %v838_v34, 0.0 }
 0x252   :  { %v833_v41 = vadd.f32 %v832_v40, %v2254_v14  ;;  %v944_v45 = vmax.f32 %v830_v36, 0.0 }
 0x253   :  { %v947_v43 = vmax.f32 %v841_v39, 0.0 }
 0x254   :  { %v945_v46 = vmax.f32 %v833_v41, 0.0 }
 0x255   :  { %v975_v47 = vpack.c.bf16 %v947_v43, %v946_v42 }
 0x256   :  { %v974_v44 = vpack.c.bf16 %v945_v46, %v944_v45  ;;  %v1712_v48 = vpop.f32.mrb[24].mxu1 }
 0x257   :  { %v854_v49 = vadd.f32 %v1712_v48, %v2254_v14  ;;  %v845_v50 = vpop.f32.mrb[25].mxu1 }
 0x258   :  { %v846_v51 = vadd.f32 %v845_v50, %v2254_v14  ;;  %v1713_v52 = vpop.f32.mrb[26].mxu1  ;;  %1754 = vmatprep.mubr.bf16.mxu0 %v974_v44 }
 0x259   :  { %v857_v25 = vadd.f32 %v1713_v52, %v2254_v14  ;;  %v848_v53 = vpop.f32.mrb[27].mxu1  ;;  %1755 = vmatmul.mubr.bf16.gmra.mrb[20].mxu0 %v975_v47  ;;  %v950_v55 = vmax.f32 %v854_v49, 0.0 }
 0x25a   :  { %v849_v54 = vadd.f32 %v848_v53, %v2254_v14  ;;  %v948_v57 = vmax.f32 %v846_v51, 0.0 }
 0x25b   :  { %v951_v56 = vmax.f32 %v857_v25, 0.0 }
 0x25c   :  { %v949_v58 = vmax.f32 %v849_v54, 0.0 }
 0x25d   :  { %v977_v59 = vpack.c.bf16 %v951_v56, %v950_v55 }
 0x25e   :  { %v976_v60 = vpack.c.bf16 %v949_v58, %v948_v57  ;;  %v1716_v61 = vpop.f32.mrb[28].mxu1 }
 0x25f   :  { %v870_v62 = vadd.f32 %v1716_v61, %v2254_v14  ;;  %v861_v63 = vpop.f32.mrb[29].mxu1 }
 0x260   :  { %v862_v0 = vadd.f32 %v861_v63, %v2254_v14  ;;  %v1717_v1 = vpop.f32.mrb[30].mxu1  ;;  %1758 = vmatprep.mubr.bf16.mxu0 %v976_v60 }
 0x261   :  { %v873_v2 = vadd.f32 %v1717_v1, %v2254_v14  ;;  %v864_v3 = vpop.f32.mrb[31].mxu1  ;;  %1759 = vmatmul.mubr.bf16.gmra.mrb[24].mxu0 %v977_v59  ;;  %v954_v5 = vmax.f32 %v870_v62, 0.0 }
 0x262   :  { %v865_v4 = vadd.f32 %v864_v3, %v2254_v14  ;;  %v952_v7 = vmax.f32 %v862_v0, 0.0 }
 0x263   :  { %v955_v6 = vmax.f32 %v873_v2, 0.0 }
 0x264   :  { %v953_v8 = vmax.f32 %v865_v4, 0.0 }
 0x265   :  { %v979_v9 = vpack.c.bf16 %v955_v6, %v954_v5  ;;  %v1004_v5 = vld [vmem:[%s2382_s8] sm:$0x1] }
 0x266   :  { %v978_v10 = vpack.c.bf16 %v953_v8, %v952_v7  ;;  %v1720_v33 = vpop.f32.mrb[32].mxu1  ;;  %v1005_v6 = vunpack.c.l.bf16 %v1004_v5 }
 0x267   :  { %v886_v11 = vadd.f32 %v1720_v33, %v2254_v14  ;;  %v877_v13 = vpop.f32.mrb[33].mxu1 }
 0x268   :  { %v878_v24 = vadd.f32 %v877_v13, %v2254_v14  ;;  %v1721_v12 = vpop.f32.mrb[34].mxu1  ;;  %1762 = vmatprep.mubr.bf16.mxu0 %v978_v10  ;;  %v2292_v7 = vrot.slane %v1005_v6, %v2088_v31 }
 0x269   :  { %v889_v38 = vadd.f32 %v1721_v12, %v2254_v14  ;;  %v880_v15 = vpop.f32.mrb[35].mxu1  ;;  %1763 = vmatmul.mubr.bf16.gmra.mrb[28].mxu0 %v979_v9  ;;  %v958_v17 = vmax.f32 %v886_v11, 0.0 }
 0x26a   :  { %v881_v16 = vadd.f32 %v880_v15, %v2254_v14  ;;  %v956_v19 = vmax.f32 %v878_v24, 0.0 }
 0x26b   :  { %v959_v18 = vmax.f32 %v889_v38, 0.0 }
 0x26c   :  { %v957_v20 = vmax.f32 %v881_v16, 0.0 }
 0x26d   :  { %v981_v21 = vpack.c.bf16 %v959_v18, %v958_v17 }
 0x26e   :  { %v980_v23 = vpack.c.bf16 %v957_v20, %v956_v19  ;;  %v1724_v22 = vpop.f32.mrb[36].mxu1 }
 0x26f   :  { %v902_v26 = vadd.f32 %v1724_v22, %v2254_v14  ;;  %v893_v27 = vpop.f32.mrb[37].mxu1 }
 0x270   :  { %v894_v28 = vadd.f32 %v893_v27, %v2254_v14  ;;  %v1725_v29 = vpop.f32.mrb[38].mxu1  ;;  %1766 = vmatprep.mubr.bf16.mxu0 %v980_v23 }
 0x271   :  { %v905_v30 = vadd.f32 %v1725_v29, %v2254_v14  ;;  %v896_v32 = vpop.f32.mrb[39].mxu1  ;;  %1767 = vmatmul.mubr.bf16.gmra.mrb[32].mxu0 %v981_v21  ;;  %v962_v35 = vmax.f32 %v902_v26, 0.0 }
 0x272   :  { %v897_v34 = vadd.f32 %v896_v32, %v2254_v14  ;;  %v960_v37 = vmax.f32 %v894_v28, 0.0 }
 0x273   :  { %v963_v36 = vmax.f32 %v905_v30, 0.0 }
 0x274   :  { %v961_v39 = vmax.f32 %v897_v34, 0.0 }
 0x275   :  { %v983_v40 = vpack.c.bf16 %v963_v36, %v962_v35 }
 0x276   :  { %v982_v41 = vpack.c.bf16 %v961_v39, %v960_v37  ;;  %v1728_v42 = vpop.f32.mrb[40].mxu1 }
 0x277   :  { %v918_v43 = vadd.f32 %v1728_v42, %v2254_v14  ;;  %v909_v45 = vpop.f32.mrb[41].mxu1 }
 0x278   :  { %v910_v46 = vadd.f32 %v909_v45, %v2254_v14  ;;  %v1729_v47 = vpop.f32.mrb[42].mxu1  ;;  %1770 = vmatprep.mubr.bf16.mxu0 %v982_v41 }
 0x279   :  { %v921_v44 = vadd.f32 %v1729_v47, %v2254_v14  ;;  %v912_v48 = vpop.f32.mrb[43].mxu1  ;;  %1771 = vmatmul.mubr.bf16.gmra.mrb[36].mxu0 %v983_v40  ;;  %v966_v50 = vmax.f32 %v918_v43, 0.0 }
 0x27a   :  { %v913_v49 = vadd.f32 %v912_v48, %v2254_v14  ;;  %v964_v52 = vmax.f32 %v910_v46, 0.0 }
 0x27b   :  { %v967_v51 = vmax.f32 %v921_v44, 0.0 }
 0x27c   :  { %v965_v25 = vmax.f32 %v913_v49, 0.0 }
 0x27d   :  { %v985_v53 = vpack.c.bf16 %v967_v51, %v966_v50 }
 0x27e   :  { %v984_v54 = vpack.c.bf16 %v965_v25, %v964_v52  ;;  %v1732_v55 = vpop.f32.mrb[44].mxu1 }
 0x27f   :  { %v934_v56 = vadd.f32 %v1732_v55, %v2254_v14  ;;  %v925_v57 = vpop.f32.mrb[45].mxu1 }
 0x280   :  { %v926_v58 = vadd.f32 %v925_v57, %v2254_v14  ;;  %v1733_v59 = vpop.f32.mrb[46].mxu1  ;;  %1774 = vmatprep.mubr.bf16.mxu0 %v984_v54 }
 0x281   :  { %v937_v60 = vadd.f32 %v1733_v59, %v2254_v14  ;;  %v928_v61 = vpop.f32.mrb[47].mxu1  ;;  %1775 = vmatmul.mubr.bf16.gmra.mrb[40].mxu0 %v985_v53  ;;  %v970_v63 = vmax.f32 %v934_v56, 0.0 }
 0x282   :  { %v929_v62 = vadd.f32 %v928_v61, %v2254_v14  ;;  %v968_v1 = vmax.f32 %v926_v58, 0.0 }
 0x283   :  { %v971_v0 = vmax.f32 %v937_v60, 0.0 }
 0x284   :  { %v969_v2 = vmax.f32 %v929_v62, 0.0 }
 0x285   :  { %v987_v3 = vpack.c.bf16 %v971_v0, %v970_v63 }
 0x286   :  { %v986_v4 = vpack.c.bf16 %v969_v2, %v968_v1 }
 0x288   :  { %1778 = vmatprep.mubr.bf16.mxu0 %v986_v4 }
 0x289   :  { %1779 = vmatmul.mubr.bf16.gmra.mrb[44].mxu0 %v987_v3 }
 0x324   :  { %v1752_v8 = vpop.f32.mrb[16].mxu0 }
 0x325   :  { %v1092_v9 = vpop.f32.mrb[17].mxu0  ;;  %v1101_v14 = vadd.f32 %v1752_v8, %v2292_v7 }
 0x326   :  { %v1753_v10 = vpop.f32.mrb[18].mxu0  ;;  %v1093_v13 = vadd.f32 %v1092_v9, %v2292_v7 }
 0x327   :  { %v1104_v33 = vadd.f32 %v1753_v10, %v2292_v7  ;;  %v1095_v11 = vpop.f32.mrb[19].mxu0 }
 0x328   :  { %v1096_v24 = vadd.f32 %v1095_v11, %v2292_v7 }
 0x329   :  { %v1479_v12 = vpack.c.bf16 %v1104_v33, %v1101_v14 }
 0x32a   :  { %v1474_v38 = vpack.c.bf16 %v1096_v24, %v1093_v13 }
 0x32b   :  { %1551 = vst [vmem:[%s2383_s9 + $0x8] sm:$0xff] %v1479_v12  }
 0x32c   :  { %1475 = vst [vmem:[%s2383_s9] sm:$0xff] %v1474_v38   ;;  %v1756_v31 = vpop.f32.mrb[20].mxu0 }
 0x32d   :  { %v1108_v15 = vpop.f32.mrb[21].mxu0  ;;  %v1117_v17 = vadd.f32 %v1756_v31, %v2292_v7 }
 0x32e   :  { %v1757_v16 = vpop.f32.mrb[22].mxu0  ;;  %v1109_v20 = vadd.f32 %v1108_v15, %v2292_v7 }
 0x32f   :  { %v1120_v18 = vadd.f32 %v1757_v16, %v2292_v7  ;;  %v1111_v19 = vpop.f32.mrb[23].mxu0 }
 0x330   :  { %v1112_v21 = vadd.f32 %v1111_v19, %v2292_v7 }
 0x331   :  { %v1489_v23 = vpack.c.bf16 %v1120_v18, %v1117_v17 }
 0x332   :  { %v1484_v22 = vpack.c.bf16 %v1112_v21, %v1109_v20 }
 0x333   :  { %1553 = vst [vmem:[%s2383_s9 + $0x18] sm:$0xff] %v1489_v23  }
 0x334   :  { %1552 = vst [vmem:[%s2383_s9 + $0x10] sm:$0xff] %v1484_v22   ;;  %v1760_v26 = vpop.f32.mrb[24].mxu0 }
 0x335   :  { %v1124_v27 = vpop.f32.mrb[25].mxu0  ;;  %v1133_v29 = vadd.f32 %v1760_v26, %v2292_v7 }
 0x336   :  { %v1761_v28 = vpop.f32.mrb[26].mxu0  ;;  %v1125_v34 = vadd.f32 %v1124_v27, %v2292_v7 }
 0x337   :  { %v1136_v30 = vadd.f32 %v1761_v28, %v2292_v7  ;;  %v1127_v32 = vpop.f32.mrb[27].mxu0 }
 0x338   :  { %v1128_v35 = vadd.f32 %v1127_v32, %v2292_v7 }
 0x339   :  { %v1499_v36 = vpack.c.bf16 %v1136_v30, %v1133_v29 }
 0x33a   :  { %v1494_v37 = vpack.c.bf16 %v1128_v35, %v1125_v34 }
 0x33b   :  { %1555 = vst [vmem:[%s2383_s9 + $0x28] sm:$0xff] %v1499_v36  }
 0x33c   :  { %1554 = vst [vmem:[%s2383_s9 + $0x20] sm:$0xff] %v1494_v37   ;;  %v1764_v39 = vpop.f32.mrb[28].mxu0 }
 0x33d   :  { %v1140_v40 = vpop.f32.mrb[29].mxu0  ;;  %v1149_v42 = vadd.f32 %v1764_v39, %v2292_v7 }
 0x33e   :  { %v1765_v41 = vpop.f32.mrb[30].mxu0  ;;  %v1141_v46 = vadd.f32 %v1140_v40, %v2292_v7 }
 0x33f   :  { %v1152_v43 = vadd.f32 %v1765_v41, %v2292_v7  ;;  %v1143_v45 = vpop.f32.mrb[31].mxu0 }
 0x340   :  { %v1144_v47 = vadd.f32 %v1143_v45, %v2292_v7 }
 0x341   :  { %v1509_v44 = vpack.c.bf16 %v1152_v43, %v1149_v42 }
 0x342   :  { %v1504_v48 = vpack.c.bf16 %v1144_v47, %v1141_v46 }
 0x343   :  { %1557 = vst [vmem:[%s2383_s9 + $0x38] sm:$0xff] %v1509_v44  }
 0x344   :  { %1556 = vst [vmem:[%s2383_s9 + $0x30] sm:$0xff] %v1504_v48   ;;  %v1768_v49 = vpop.f32.mrb[32].mxu0 }
 0x345   :  { %v1156_v50 = vpop.f32.mrb[33].mxu0  ;;  %v1165_v52 = vadd.f32 %v1768_v49, %v2292_v7 }
 0x346   :  { %v1769_v51 = vpop.f32.mrb[34].mxu0  ;;  %v1157_v54 = vadd.f32 %v1156_v50, %v2292_v7 }
 0x347   :  { %v1168_v25 = vadd.f32 %v1769_v51, %v2292_v7  ;;  %v1159_v53 = vpop.f32.mrb[35].mxu0 }
 0x348   :  { %v1160_v55 = vadd.f32 %v1159_v53, %v2292_v7 }
 0x349   :  { %v1519_v56 = vpack.c.bf16 %v1168_v25, %v1165_v52 }
 0x34a   :  { %v1514_v57 = vpack.c.bf16 %v1160_v55, %v1157_v54 }
 0x34b   :  { %1559 = vst [vmem:[%s2383_s9 + $0x48] sm:$0xff] %v1519_v56  }
 0x34c   :  { %1558 = vst [vmem:[%s2383_s9 + $0x40] sm:$0xff] %v1514_v57   ;;  %v1772_v58 = vpop.f32.mrb[36].mxu0 }
 0x34d   :  { %v1172_v59 = vpop.f32.mrb[37].mxu0  ;;  %v1181_v61 = vadd.f32 %v1772_v58, %v2292_v7 }
 0x34e   :  { %v1773_v60 = vpop.f32.mrb[38].mxu0  ;;  %v1173_v0 = vadd.f32 %v1172_v59, %v2292_v7 }
 0x34f   :  { %v1184_v62 = vadd.f32 %v1773_v60, %v2292_v7  ;;  %v1175_v63 = vpop.f32.mrb[39].mxu0 }
 0x350   :  { %v1176_v1 = vadd.f32 %v1175_v63, %v2292_v7 }
 0x351   :  { %v1529_v2 = vpack.c.bf16 %v1184_v62, %v1181_v61 }
 0x352   :  { %v1524_v3 = vpack.c.bf16 %v1176_v1, %v1173_v0 }
 0x353   :  { %1561 = vst [vmem:[%s2383_s9 + $0x58] sm:$0xff] %v1529_v2  }
 0x354   :  { %1560 = vst [vmem:[%s2383_s9 + $0x50] sm:$0xff] %v1524_v3   ;;  %v1776_v4 = vpop.f32.mrb[40].mxu0 }
 0x355   :  { %v1188_v5 = vpop.f32.mrb[41].mxu0  ;;  %v1197_v8 = vadd.f32 %v1776_v4, %v2292_v7 }
 0x356   :  { %v1777_v6 = vpop.f32.mrb[42].mxu0  ;;  %v1189_v14 = vadd.f32 %v1188_v5, %v2292_v7 }
 0x357   :  { %v1200_v9 = vadd.f32 %v1777_v6, %v2292_v7  ;;  %v1191_v10 = vpop.f32.mrb[43].mxu0 }
 0x358   :  { %v1192_v33 = vadd.f32 %v1191_v10, %v2292_v7 }
 0x359   :  { %v1539_v11 = vpack.c.bf16 %v1200_v9, %v1197_v8 }
 0x35a   :  { %v1534_v13 = vpack.c.bf16 %v1192_v33, %v1189_v14 }
 0x35b   :  { %1563 = vst [vmem:[%s2383_s9 + $0x68] sm:$0xff] %v1539_v11  }
 0x35c   :  { %1562 = vst [vmem:[%s2383_s9 + $0x60] sm:$0xff] %v1534_v13   ;;  %v1780_v24 = vpop.f32.mrb[44].mxu0 }
 0x35d   :  { %v1204_v12 = vpop.f32.mrb[45].mxu0  ;;  %v1213_v31 = vadd.f32 %v1780_v24, %v2292_v7 }
 0x35e   :  { %v1781_v38 = vpop.f32.mrb[46].mxu0  ;;  %v1205_v17 = vadd.f32 %v1204_v12, %v2292_v7 }
 0x35f   :  { %v1216_v15 = vadd.f32 %v1781_v38, %v2292_v7  ;;  %v1207_v16 = vpop.f32.mrb[47].mxu0 }
 0x360   :  { %v1208_v18 = vadd.f32 %v1207_v16, %v2292_v7 }
 0x361   :  { %v1549_v19 = vpack.c.bf16 %v1216_v15, %v1213_v31 }
 0x362   :  { %v1544_v20 = vpack.c.bf16 %v1208_v18, %v1205_v17 }
 0x363   :  { %1565 = vst [vmem:[%s2383_s9 + $0x78] sm:$0xff] %v1549_v19  }
 0x364   :  { %1564 = vst [vmem:[%s2383_s9 + $0x70] sm:$0xff] %v1544_v20  }

</bundles_post_ra>
